<compile_context>
chip_gen: v7x
topology: tpu7x:2x2x1
jax: 0.10.0
libtpu: 0.0.40
codegen_flags: <defaults>
</compile_context>

<pallas_src>
import functools

import jax
import jax.numpy as jnp
from jax import lax
from jax.experimental import pallas as pl
from jax.experimental.pallas import tpu as pltpu


def _round_up(x, m):
    return ((x + m - 1) // m) * m


_SQRT_HALF = 0.7071067811865476


def _mlp_kernel(x_ref, w1_ref, b1_ref, w2_ref, b2_ref, o_ref, acc_ref, *, hk, n_hk):
    # x_ref:  (tm, C_in_p)        w1_ref: (C_in_p, H_p)   b1_ref: (1, H_p)
    # w2_ref: (H_p, C_out_p)      b2_ref: (1, C_out_p)
    # o_ref:  (tm, C_out_p)       acc_ref: (tm, C_out_p) f32 scratch
    acc_ref[...] = jnp.zeros_like(acc_ref)

    def h_chunk(k, carry):
        off = pl.multiple_of(k * hk, hk)
        # fc1 on an hk-wide slice of the hidden dim: native-dtype MXU, f32 accumulate.
        h = jnp.dot(x_ref[...], w1_ref[:, pl.ds(off, hk)],
                    preferred_element_type=jnp.float32)
        h = h + b1_ref[:, pl.ds(off, hk)].astype(jnp.float32)
        # Exact GELU: 0.5 * x * (1 + erf(x / sqrt(2)))  (torch.nn.GELU default), in f32.
        h = 0.5 * h * (1.0 + lax.erf(h * jnp.float32(_SQRT_HALF)))
        # fc2 contribution of this hidden chunk, accumulated in f32.
        acc_ref[...] += jnp.dot(h.astype(w2_ref.dtype), w2_ref[pl.ds(off, hk), :],
                                preferred_element_type=jnp.float32)
        return carry

    lax.fori_loop(0, n_hk, h_chunk, 0, unroll=(n_hk <= 8))

    o_ref[...] = (acc_ref[...] + b2_ref[...].astype(jnp.float32)).astype(o_ref.dtype)


def mlp_pallas(x, w1, b1, w2, b2, *, tm=512, hk_target=512):
    """x: (B, N, C_in); w1: (C_in, H); b1: (H,); w2: (H, C_out); b2: (C_out,)."""
    B, N, C_in = x.shape
    H = w1.shape[1]
    C_out = w2.shape[1]

    LANE = 128
    itemsize = jnp.dtype(x.dtype).itemsize
    sub = 8 if itemsize >= 4 else 16  # sublane packing (f32 -> 8, bf16 -> 16)

    # Channel padding (lane-dense MXU operands / stores). No-op for real ViT widths.
    C_in_p = _round_up(C_in, LANE)
    C_out_p = _round_up(C_out, LANE)

    # Hidden-dim chunk: a 256-multiple (v6e/v7x MXU contraction depth) when H allows,
    # else the full (128-padded) hidden dim.
    if H >= hk_target:
        hk = hk_target
    else:
        hk = _round_up(H, LANE)
    H_p = _round_up(H, hk)
    n_hk = H_p // hk

    # Token tile: big by default, sublane aligned, clamped to the input size.
    M = B * N
    tm_eff = min(tm, _round_up(M, sub))
    tm_eff = _round_up(tm_eff, sub)
    # Guarantee >= 2 grid steps when possible so v7x megacore can split the parallel axis.
    if pl.cdiv(M, tm_eff) < 2 and M > sub:
        tm_eff = _round_up(pl.cdiv(M, 2), sub)
    n_m = pl.cdiv(M, tm_eff)  # no M padding: partial tile is masked, rows independent

    # Wrapper-side channel zero-padding only where needed (exact because GELU(0)=0 and
    # padded W2 rows / b1 entries are 0 — keep this invariant if the activation changes).
    x2 = x.reshape(M, C_in)
    if C_in_p != C_in:
        x2 = jnp.pad(x2, ((0, 0), (0, C_in_p - C_in)))
    w1_p = w1 if (C_in_p == C_in and H_p == H) else jnp.pad(
        w1, ((0, C_in_p - C_in), (0, H_p - H)))
    b1_p = (b1 if H_p == H else jnp.pad(b1, (0, H_p - H))).reshape(1, H_p)
    w2_p = w2 if (H_p == H and C_out_p == C_out) else jnp.pad(
        w2, ((0, H_p - H), (0, C_out_p - C_out)))
    b2_p = (b2 if C_out_p == C_out else jnp.pad(b2, (0, C_out_p - C_out))).reshape(1, C_out_p)

    w_itemsize = jnp.dtype(w1_p.dtype).itemsize

    # Scoped-VMEM budget: double-buffered x/out tiles + resident (double-buffered)
    # weights + f32 accumulator, plus headroom. Default scoped limits (16/32 MiB) are
    # too small for production widths.
    vmem_need = (
        2 * tm_eff * C_in_p * itemsize          # x tile (double-buffered)
        + 2 * tm_eff * C_out_p * itemsize       # out tile (double-buffered)
        + 2 * (C_in_p * H_p + H_p * C_out_p) * w_itemsize   # W1/W2 (pipeline buffers)
        + 2 * (H_p + C_out_p) * w_itemsize      # biases
        + tm_eff * C_out_p * 4                  # f32 accumulator scratch
    )
    vmem_limit = int(min(max(vmem_need * 1.25 + (2 << 20), 32 << 20), 128 << 20))

    m_comp = n_m * tm_eff
    bytes_accessed = (
        x2.size * itemsize
        + (w1_p.size + w2_p.size + b1_p.size + b2_p.size) * w_itemsize
        + M * C_out_p * itemsize
    )
    cost = pl.CostEstimate(
        flops=2 * m_comp * (C_in_p * H_p + H_p * C_out_p),
        transcendentals=m_comp * H_p,
        bytes_accessed=int(bytes_accessed),
    )

    kernel = functools.partial(_mlp_kernel, hk=hk, n_hk=n_hk)

    out_p = pl.pallas_call(
        kernel,
        out_shape=jax.ShapeDtypeStruct((M, C_out_p), x.dtype),
        grid_spec=pltpu.PrefetchScalarGridSpec(
            num_scalar_prefetch=0,
            grid=(n_m,),
            in_specs=[
                pl.BlockSpec((tm_eff, C_in_p), lambda i: (i, 0)),   # x tile
                pl.BlockSpec((C_in_p, H_p), lambda i: (0, 0)),      # W1 (grid-invariant)
                pl.BlockSpec((1, H_p), lambda i: (0, 0)),           # b1
                pl.BlockSpec((H_p, C_out_p), lambda i: (0, 0)),     # W2 (grid-invariant)
                pl.BlockSpec((1, C_out_p), lambda i: (0, 0)),       # b2
            ],
            out_specs=pl.BlockSpec((tm_eff, C_out_p), lambda i: (i, 0)),
            scratch_shapes=[pltpu.VMEM((tm_eff, C_out_p), jnp.float32)],
        ),
        compiler_params=pltpu.CompilerParams(
            dimension_semantics=("parallel",),
            vmem_limit_bytes=vmem_limit,
        ),
        cost_estimate=cost,
    )(x2, w1_p, b1_p, w2_p, b2_p)

    return out_p[:, :C_out].reshape(B, N, C_out)


def mlp_reference(x, w1, b1, w2, b2):
    h = jnp.einsum("bnc,ch->bnh", x, w1) + b1
    h = 0.5 * h * (1.0 + lax.erf(h / jnp.sqrt(2.0)))
    return jnp.einsum("bnh,ho->bno", h, w2) + b2


if __name__ == "__main__":
    # Small shapes consistent with the module: in_features=32, hidden=64, out=32.
    B, N, C_in, H, C_out = 2, 8, 32, 64, 32

    key = jax.random.PRNGKey(0)
    kx, kw1, kb1, kw2, kb2 = jax.random.split(key, 5)

    x = jax.random.normal(kx, (B, N, C_in), dtype=jnp.float32)

    # PyTorch Linear stores (out, in); we keep (in, out) so the kernel computes
    # x @ W + b, equivalent to x @ W_pt.T + b.
    w1 = jax.random.normal(kw1, (C_in, H), dtype=jnp.float32) * 0.02
    b1 = jax.random.normal(kb1, (H,), dtype=jnp.float32) * 0.02
    w2 = jax.random.normal(kw2, (H, C_out), dtype=jnp.float32) * 0.02
    b2 = jax.random.normal(kb2, (C_out,), dtype=jnp.float32) * 0.02

    out = mlp_pallas(x, w1, b1, w2, b2)
    out = jax.block_until_ready(out)

    ref = mlp_reference(x, w1, b1, w2, b2)
    assert out.shape == (B, N, C_out)
    assert jnp.allclose(out, ref, atol=1e-5, rtol=1e-5)

    print("KERNEL_OK")
</pallas_src>

<mosaic_0001>
module attributes {stable_mosaic.version = 11 : i64} {
  func.func @_mlp_kernel(%arg0: i32, %arg1: memref<8x128xf32, #tpu.memory_space<vmem>>, %arg2: memref<128x128xf32, #tpu.memory_space<vmem>>, %arg3: memref<1x128xf32, #tpu.memory_space<vmem>>, %arg4: memref<128x128xf32, #tpu.memory_space<vmem>>, %arg5: memref<1x128xf32, #tpu.memory_space<vmem>>, %arg6: memref<8x128xf32, #tpu.memory_space<vmem>>, %arg7: memref<8x128xf32, #tpu.memory_space<vmem>>) attributes {dimension_semantics = [#tpu.dimension_semantics<parallel>], iteration_bounds = array<i64: 2>, scalar_prefetch = 0 : i64, scratch_operands = 1 : i64, tpu.core_type = #tpu.core_type<tc>, window_params = [{transform_indices = @transform_0, window_bounds = array<i64: 8, 128>}, {pipeline_mode = #tpu.pipeline_mode<synchronous>, transform_indices = @transform_1, window_bounds = array<i64: 128, 128>}, {pipeline_mode = #tpu.pipeline_mode<synchronous>, transform_indices = @transform_2, window_bounds = array<i64: 1, 128>}, {pipeline_mode = #tpu.pipeline_mode<synchronous>, transform_indices = @transform_3, window_bounds = array<i64: 128, 128>}, {pipeline_mode = #tpu.pipeline_mode<synchronous>, transform_indices = @transform_4, window_bounds = array<i64: 1, 128>}, {transform_indices = @transform_5, window_bounds = array<i64: 8, 128>}]} {
    %cst = arith.constant 0.000000e+00 : f32
    %0 = vector.broadcast %cst : f32 to vector<8x128xf32>
    %c0 = arith.constant 0 : index
    %c0_0 = arith.constant 0 : index
    %1 = vector.load %arg7[%c0, %c0_0] : memref<8x128xf32, #tpu.memory_space<vmem>>, vector<8x128xf32>
    tpu.vector_store %arg7[%c0, %c0_0], %0 {strides = array<i32>} : memref<8x128xf32, #tpu.memory_space<vmem>>, vector<8x128xf32>,
    %c0_i32 = arith.constant 0 : i32
    %c128_i32 = arith.constant 128 : i32
    %2 = arith.muli %c0_i32, %c128_i32 : i32
    %3 = tpu.assume_multiple %2, 128 : i32
    %c0_1 = arith.constant 0 : index
    %c0_2 = arith.constant 0 : index
    %4 = vector.load %arg1[%c0_1, %c0_2] : memref<8x128xf32, #tpu.memory_space<vmem>>, vector<8x128xf32>
    %c0_3 = arith.constant 0 : index
    %5 = arith.index_cast %3 : i32 to index
    %6 = vector.load %arg2[%c0_3, %5] : memref<128x128xf32, #tpu.memory_space<vmem>>, vector<128x128xf32>
    %cst_4 = arith.constant dense<0.000000e+00> : vector<8x128xf32>
    %7 = tpu.matmul %4, %6, %cst_4 {dimension_numbers = #tpu.dot_dimension_numbers<[1], [0], [0], [1], [0, 0, 1, 1], [], []>} : vector<8x128xf32>, vector<128x128xf32>, vector<8x128xf32> -> vector<8x128xf32>
    %c0_5 = arith.constant 0 : index
    %8 = arith.index_cast %3 : i32 to index
    %9 = vector.load %arg3[%c0_5, %8] : memref<1x128xf32, #tpu.memory_space<vmem>>, vector<1x128xf32>
    %10 = vector.broadcast %9 : vector<1x128xf32> to vector<8x128xf32>
    %11 = arith.addf %7, %10 : vector<8x128xf32>
    %cst_6 = arith.constant 5.000000e-01 : f32
    %12 = vector.broadcast %cst_6 : f32 to vector<8x128xf32>
    %13 = arith.mulf %12, %11 : vector<8x128xf32>
    %cst_7 = arith.constant 0.707106769 : f32
    %14 = vector.broadcast %cst_7 : f32 to vector<8x128xf32>
    %15 = arith.mulf %11, %14 : vector<8x128xf32>
    %16 = math.erf %15 : vector<8x128xf32>
    %cst_8 = arith.constant 1.000000e+00 : f32
    %17 = vector.broadcast %cst_8 : f32 to vector<8x128xf32>
    %18 = arith.addf %17, %16 : vector<8x128xf32>
    %19 = arith.mulf %13, %18 : vector<8x128xf32>
    %c0_9 = arith.constant 0 : index
    %c0_10 = arith.constant 0 : index
    %20 = vector.load %arg7[%c0_9, %c0_10] : memref<8x128xf32, #tpu.memory_space<vmem>>, vector<8x128xf32>
    %21 = arith.index_cast %3 : i32 to index
    %c0_11 = arith.constant 0 : index
    %22 = vector.load %arg4[%21, %c0_11] : memref<128x128xf32, #tpu.memory_space<vmem>>, vector<128x128xf32>
    %cst_12 = arith.constant dense<0.000000e+00> : vector<8x128xf32>
    %23 = tpu.matmul %19, %22, %cst_12 {dimension_numbers = #tpu.dot_dimension_numbers<[1], [0], [0], [1], [0, 0, 1, 1], [], []>} : vector<8x128xf32>, vector<128x128xf32>, vector<8x128xf32> -> vector<8x128xf32>
    %24 = arith.addf %20, %23 : vector<8x128xf32>
    %c0_13 = arith.constant 0 : index
    %c0_14 = arith.constant 0 : index
    %25 = vector.load %arg7[%c0_13, %c0_14] : memref<8x128xf32, #tpu.memory_space<vmem>>, vector<8x128xf32>
    tpu.vector_store %arg7[%c0_13, %c0_14], %24 {strides = array<i32>} : memref<8x128xf32, #tpu.memory_space<vmem>>, vector<8x128xf32>,
    %c1_i32 = arith.constant 1 : i32
    %c0_15 = arith.constant 0 : index
    %c0_16 = arith.constant 0 : index
    %26 = vector.load %arg7[%c0_15, %c0_16] : memref<8x128xf32, #tpu.memory_space<vmem>>, vector<8x128xf32>
    %c0_17 = arith.constant 0 : index
    %c0_18 = arith.constant 0 : index
    %27 = vector.load %arg5[%c0_17, %c0_18] : memref<1x128xf32, #tpu.memory_space<vmem>>, vector<1x128xf32>
    %28 = vector.broadcast %27 : vector<1x128xf32> to vector<8x128xf32>
    %29 = arith.addf %26, %28 : vector<8x128xf32>
    %c0_19 = arith.constant 0 : index
    %c0_20 = arith.constant 0 : index
    %30 = vector.load %arg6[%c0_19, %c0_20] : memref<8x128xf32, #tpu.memory_space<vmem>>, vector<8x128xf32>
    tpu.vector_store %arg6[%c0_19, %c0_20], %29 {strides = array<i32>} : memref<8x128xf32, #tpu.memory_space<vmem>>, vector<8x128xf32>,
    return
  }
  func.func @transform_0(%arg0: i32) -> (i32, i32) {
    %c0_i32 = arith.constant 0 : i32
    %c0_i32_0 = arith.constant 0 : i32
    return %arg0, %c0_i32 : i32, i32
  }
  func.func @transform_1(%arg0: i32) -> (i32, i32) {
    %c0_i32 = arith.constant 0 : i32
    %c0_i32_0 = arith.constant 0 : i32
    %c0_i32_1 = arith.constant 0 : i32
    return %c0_i32, %c0_i32_0 : i32, i32
  }
  func.func @transform_2(%arg0: i32) -> (i32, i32) {
    %c0_i32 = arith.constant 0 : i32
    %c0_i32_0 = arith.constant 0 : i32
    %c0_i32_1 = arith.constant 0 : i32
    return %c0_i32, %c0_i32_0 : i32, i32
  }
  func.func @transform_3(%arg0: i32) -> (i32, i32) {
    %c0_i32 = arith.constant 0 : i32
    %c0_i32_0 = arith.constant 0 : i32
    %c0_i32_1 = arith.constant 0 : i32
    return %c0_i32, %c0_i32_0 : i32, i32
  }
  func.func @transform_4(%arg0: i32) -> (i32, i32) {
    %c0_i32 = arith.constant 0 : i32
    %c0_i32_0 = arith.constant 0 : i32
    %c0_i32_1 = arith.constant 0 : i32
    return %c0_i32, %c0_i32_0 : i32, i32
  }
  func.func @transform_5(%arg0: i32) -> (i32, i32) {
    %c0_i32 = arith.constant 0 : i32
    %c0_i32_0 = arith.constant 0 : i32
    return %arg0, %c0_i32 : i32, i32
  }
}

</mosaic_0001>

<bundles_post_ra>
// kernel: tpu_custom_call.1
= control target key start
LH: loop header
LB: loop body
LE: loop exit
PB: predicated region body
PF: predicated region fallthrough
CT: control target
= control target key end

     0   :  { %10 = vsyncpa [#allocation4], 0  ;;  %s1270_s0 = inlined_call_operand.hbm [shape: f32[16,128], index: 0, kind: input, shape index: {}]   ;;  %s1271_s1 = inlined_call_operand.hbm [shape: f32[128,128], index: 1, kind: input, shape index: {}]   ;;  %s1272_s2 = inlined_call_operand.vmem [shape: f32[1,128], index: 2, kind: input, shape index: {}]   ;;  %s1273_s3 = inlined_call_operand.hbm [shape: f32[128,128], index: 3, kind: input, shape index: {}]   ;;  %s1274_s4 = inlined_call_operand.vmem [shape: f32[1,128], index: 4, kind: input, shape index: {}]   ;;  %s1275_s5 = inlined_call_operand.hbm [shape: f32[16,128], index: 5, kind: output, shape index: {}]  }
   0x1   :  { %12 = vsyncpa [#allocation4 + $0x1], 0 }
   0x2   :  { %13 = vsyncpa [#allocation7], 0 }
   0x3   :  { %14 = vsyncpa [#allocation5], 0 }
   0x4   :  { %16 = vsyncpa [#allocation5 + $0x1], 0  ;;  %s1012_s18 = smov 0   ;;  %s1014_s19 = smov 0  }
   0x5   :  { %s1016_s20 = smov 0   ;;  %s1018_s21 = smov 0  }
   0x6 LB: > { %s1033_s22 = sadd.s32 4294967295, %s971_s21   ;;  %s571_s23 = sadd.s32 4294967294, %s971_s21   ;;  %s971_s21 = sphi %s1018_s21, %s1295_s21   ;;  %s967_s20 = sphi %s1016_s20, %s1294_s20   ;;  %s963_s19 = sphi %s1014_s19, %s1293_s19   ;;  %s959_s18 = sphi %s1012_s18, %s1292_s18  }
   0x7   : > { %p42_p0 = scmp.ne.s32.totalorder %s963_s19, %s959_s18  ;;  %p1276_p1 = scmp.eq.s32.totalorder %s1033_s22, 0 }
   0x8   : > { %p156_p3 = scmp.eq.s32.totalorder %s571_s23, 1  ;;  %p572_p5 = scmp.ge.s32.totalorder %s971_s21, 1 }
   0x9   : > { %p1042_p4 = por %p1276_p1, %p42_p0  ;;  %p163_p7 = scmp.lt.s32.totalorder %s971_s21, 3 }
   0xa   : > { %p1047_p6 = por %p156_p3, %p42_p0  ;;  %s973_s27 = smov [#allocation6]  }
   0xb   : > { %s1279_s24 = scalar_select %p1042_p4, 1, 0 }
   0xc   : > { %s1280_s25 = scalar_select %p1047_p6, 1, 0 }
   0xd   : > { %p1052_p8 = pnand %p572_p5, %p163_p7  ;;  %s175_s28 = sshll.u32 %s973_s27, 4  ;;  %s1056_s28 = int_to_ptr.vmem [resolvable:$true] %s175_s28 }
   0xe   : > { %s974_s30 = smov [#allocation8]   ;;  %s815_s9 = scalar_lea.hbm %s1271_s1, 2048 }
   0xf   : > { %p753_p9 = pneg %p1052_p8  ;;  %s191_s6 = sshll.u32 %s974_s30, 4  ;;  %s1067_s6 = int_to_ptr.vmem [resolvable:$true] %s191_s6 }
  0x10   : > { %p816_p12 = scmp.ne.s32.totalorder %s1271_s1, %s815_s9  ;;  %p822_p5 = scmp.lt.u32.totalorder %s815_s9, %s1271_s1 }
  0x11   : > { %p1063_p11 = pnand %p753_p9, %p1276_p1 }
  0x13   : > { %p817_p13 = pneg %p1063_p11 }
  0x15   : > { %p818_p0 = pnand %p817_p13, %p816_p12 }
  0x17   : > { %p819_p3 = pneg %p818_p0 }
  0x19   : > { %p824_p7 = pnand %p822_p5, %p819_p3 }
  0x1b   : > { %827 = shalt.err (!%p824_p7)
}
  0x1c   : > { %s828_s14 = scalar_lea.vmem %s1056_s28, 2048  ;;  %p836_p2 = scmp.lt.s32.totalorder %s1056_s28, %s1056_s28 }
  0x1d   : > { %p829_p9 = scmp.ne.s32.totalorder %s1056_s28, %s828_s14  ;;  %p837_p12 = scmp.lt.s32.totalorder %s828_s14, %s828_s14 }
  0x1f   : > { %p831_p10 = pnand %p829_p9, %p817_p13  ;;  %p838_p0 = por %p837_p12, %p836_p2 }
  0x21   : > { %p832_p1 = pneg %p831_p10 }
  0x23   : > { %p839_p6 = pnand %p838_p0, %p832_p1 }
  0x25   : > { %842 = shalt.err (!%p839_p6)
}
  0x26   : > { %s975_s15 = smov 128   ;;  %s976_s16 = smov 8  }
  0x27   : > { %756 = dma.hbm_to_vmem [thread:$0]  (!%p1063_p11), %s1271_s1, 2048, %s1056_s28, [#allocation7], %s975_s15, %s975_s15, %s976_s16  }
  0x28   : > { %s843_s7 = scalar_lea.hbm %s1273_s3, 2048 }
  0x29   : > { %p844_p2 = scmp.ne.s32.totalorder %s1273_s3, %s843_s7  ;;  %p850_p10 = scmp.lt.u32.totalorder %s843_s7, %s1273_s3 }
  0x2b   : > { %p846_p1 = pnand %p844_p2, %p817_p13 }
  0x2d   : > { %p847_p6 = pneg %p846_p1 }
  0x2f   : > { %p852_p3 = pnand %p850_p10, %p847_p6 }
  0x31   : > { %855 = shalt.err (!%p852_p3)
}
  0x32   : > { %s856_s28 = scalar_lea.vmem %s1067_s6, 2048  ;;  %p864_p12 = scmp.lt.s32.totalorder %s1067_s6, %s1067_s6 }
  0x33   : > { %p857_p5 = scmp.ne.s32.totalorder %s1067_s6, %s856_s28  ;;  %p865_p0 = scmp.lt.s32.totalorder %s856_s28, %s856_s28 }
  0x35   : > { %p859_p7 = pnand %p857_p5, %p817_p13  ;;  %p866_p2 = por %p865_p0, %p864_p12 }
  0x37   : > { %p860_p9 = pneg %p859_p7 }
  0x39   : > { %p867_p1 = pnand %p866_p2, %p860_p9 }
  0x3b   : > { %870 = shalt.err (!%p867_p1)
}
  0x3c   : > { %759 = dma.hbm_to_vmem [thread:$0]  (!%p1063_p11), %s1273_s3, 2048, %s1067_s6, [#allocation7], %s975_s15, %s975_s15, %s976_s16  }
  0x3d   : > { %s1122_s14 = sadd.s32 1, %s971_s21   ;;  %s29_s29 = sadd.s32 1, %s967_s20 }
  0x3e   : > { %s26_s17 = ssub.s32 %s971_s21, %s1122_s14  ;;  %p36_p13 = scmp.ne.s32.totalorder %s967_s20, %s963_s19 }
  0x3f   : > { %p27_p6 = scmp.eq.s32.totalorder %s26_s17, 0  ;;  %p37_p10 = scmp.eq.s32.totalorder %s971_s21, 0 }
  0x40   : > { %p1283_p3 = scmp.eq.s32.totalorder %s1033_s22, 1  ;;  %p770_p7 = scmp.lt.s32.totalorder %s971_s21, 2 }
  0x41   : > { %s1138_s27 = scalar_select %p27_p6, %s967_s20, %s29_s29  }
  0x42   : > { %p1132_p5 = por %p1283_p3, %p36_p13  ;;  %p38_p9 = por %p37_p10, %p36_p13 }
  0x43   : > { %s208_s30 = sand.u32 1, %s967_s20   ;;  %s577_s6 = sshll.u32 %s971_s21, 7 }
  0x44   : > { %s1284_s23 = scalar_select %p1132_p5, 1, 0 }
  0x45   : > { %s576_s7 = sshll.u32 %s208_s30, 3  ;;  %s1145_s8 = scalar_lea.hbm %s1270_s0, %s577_s6 }
  0x46   : > { %s212_s9 = scalar_lea.vmem [#allocation3], %s576_s7  ;;  %p1149_p11 = pnand %p770_p7, %p38_p9 }
  0x47   : > { %s219_s10 = sshll.u32 %s212_s9, 4  ;;  %s209_s28 = scalar_lea.sflag [#allocation4], %s208_s30  ;;  %s1147_s10 = int_to_ptr.vmem [resolvable:$true] %s219_s10 }
  0x48   : > { %s871_s12 = scalar_lea.hbm %s1145_s8, 128  ;;  %p873_p0 = pneg %p1149_p11 }
  0x49   : > { %p872_p12 = scmp.ne.s32.totalorder %s1145_s8, %s871_s12  ;;  %s876_s17 = scalar_lea.hbm %s1270_s0, 256 }
  0x4a   : > { %p877_p13 = scmp.lt.u32.totalorder %s1145_s8, %s1270_s0  ;;  %p878_p6 = scmp.lt.u32.totalorder %s876_s17, %s871_s12 }
  0x4b   : > { %p874_p2 = pnand %p873_p0, %p872_p12  ;;  %p880_p3 = scmp.lt.u32.totalorder %s871_s12, %s1145_s8 }
  0x4c   : > { %p879_p10 = por %p878_p6, %p877_p13 }
  0x4d   : > { %p875_p1 = pneg %p874_p2 }
  0x4e   : > { %p881_p7 = por %p880_p3, %p879_p10 }
  0x50   : > { %p882_p9 = pnand %p881_p7, %p875_p1 }
  0x52   : > { %885 = shalt.err (!%p882_p9)
}
  0x53   : > { %s886_s30 = scalar_lea.vmem %s1147_s10, 128  ;;  %s977_s15 = smov [#allocation3]  }
  0x54   : > { %p887_p12 = scmp.ne.s32.totalorder %s1147_s10, %s886_s30  ;;  %s891_s16 = sshll.u32 %s977_s15, 4  ;;  %s892_s16 = int_to_ptr.vmem [resolvable:$false] %s891_s16 }
  0x55   : > { %s893_s9 = scalar_lea.vmem %s892_s16, 256  ;;  %p894_p4 = scmp.lt.s32.totalorder %s1147_s10, %s892_s16 }
  0x56   : > { %p889_p2 = pnand %p887_p12, %p873_p0  ;;  %p895_p13 = scmp.lt.s32.totalorder %s893_s9, %s886_s30 }
  0x58   : > { %p890_p5 = pneg %p889_p2  ;;  %p896_p6 = por %p895_p13, %p894_p4 }
  0x5a   : > { %p897_p10 = pnand %p896_p6, %p890_p5 }
  0x5c   : > { %900 = shalt.err (!%p897_p10)
}
  0x5d   : > { %763 = dma.hbm_to_vmem [thread:$0]  (!%p1149_p11), %s1145_s8, 128, %s1147_s10, %s209_s28  }
  0x5e   : > { %228 = sbr.rel (%p1052_p8) target bundleno = 598 (0x256), region = 40  ;;  %s1181_s12 = sand.u32 (!%p1052_p8), 1, %s963_s19  }
  0x5f   : > { %s579_s13 = sshll.u32 (!%p1052_p8), %s1181_s12, 3  ;;  %s231_s29 = scalar_lea.sflag (!%p1052_p8), [#allocation4], %s1181_s12 }
  0x60   : > { %s1187_s17 = scalar_lea.vmem (!%p1052_p8), [#allocation3], %s579_s13  ;;  %p1286_p4 = scmp.ne.s32.totalorder (!%p1052_p8), %s1279_s24, 0 }
  0x65   : > { %946 = dma.done.wait (%p1286_p4), %s231_s29, 128  }
  0x66   : > { %948 = vsyncadd (%p1286_p4), %s231_s29, 4294967168  ;;  %p1287_p5 = scmp.eq.s32.totalorder %s1033_s22, 0 }
  0x68   : > { %950 = dma.done.wait (%p1287_p5), [#allocation7], 4096   ;;  %p1288_p8 = pmov %p1287_p5 }
  0x69   : > { %v978_v0 = vmov 0.0|0.0   ;;  %vm979_vm0 = vmmov 0   ;;  %v980_v1 = vmov 0.0   ;;  %v271_v2 = vld [vmem:[#allocation6] sm:$0xff]  ;;  %v272_v3 = vld [vmem:[#allocation6 + $0x8] sm:$0xff]  ;;  %v273_v4 = vld [vmem:[#allocation6 + $0x10] sm:$0xff] }
  0x6a   : > { %952 = vsyncadd (%p1288_p8), [#allocation7], 4294963200  ;;  %693 = vmatprep.subr.bf16.mxu0 %v978_v0  ;;  %655 = vmatprep.mubr.msk.f32.mxu0 %vm979_vm0, %v980_v1  ;;  %v694_v5 = vpack.c.bf16 %v272_v3, %v271_v2  ;;  %v274_v6 = vld [vmem:[#allocation6 + $0x18] sm:$0xff]  ;;  %v275_v8 = vld [vmem:[#allocation6 + $0x20] sm:$0xff]  ;;  %s586_s11 = sshll.u32 %s1033_s22, 7  ;;  %s268_s28 = scalar_lea.vmem [#allocation9], %s579_s13 }
  0x6b   : > { %717 = vmatprep.subr.bf16.mxu1 %v978_v0  ;;  %690 = vmatprep.mubr.msk.f32.mxu1 %vm979_vm0, %v980_v1  ;;  %v697_v7 = vpack.c.bf16 %v274_v6, %v273_v4  ;;  %v276_v9 = vld [vmem:[#allocation6 + $0x28] sm:$0xff]  ;;  %v370_v10 = vld [vmem:[#allocation8] sm:$0xff]  ;;  %v372_v12 = vld [vmem:[#allocation8 + $0x10] sm:$0xff]  ;;  %s482_s7 = sshll.u32 %s268_s28, 4  ;;  %s1226_s15 = scalar_lea.hbm %s1275_s5, %s586_s11  ;;  %s1228_s7 = int_to_ptr.vmem [resolvable:$true] %s482_s7 }
  0x6c   : > { %695 = vmatpush3.bf16.msra.mxu0 %v694_v5  ;;  %v371_v11 = vld [vmem:[#allocation8 + $0x8] sm:$0xff]  ;;  %v373_v13 = vld [vmem:[#allocation8 + $0x18] sm:$0xff]  ;;  %v700_v14 = vpack.c.bf16 %v276_v9, %v275_v8  ;;  %v277_v16 = vld [vmem:[#allocation6 + $0x30] sm:$0xff]  ;;  %s469_s16 = scalar_lea.sflag [#allocation5], %s1181_s12  ;;  %s901_s9 = scalar_lea.vmem %s1228_s7, 128 }
  0x6d   : > { %696 = vmatprep.subr.bf16.mxu0 %v978_v0  ;;  %v718_v15 = vpack.c.bf16 %v371_v11, %v370_v10  ;;  %v278_v17 = vld [vmem:[#allocation6 + $0x38] sm:$0xff]  ;;  %v721_v18 = vpack.c.bf16 %v373_v13, %v372_v12  ;;  %v374_v19 = vld [vmem:[#allocation8 + $0x20] sm:$0xff]  ;;  %v375_v20 = vld [vmem:[#allocation8 + $0x28] sm:$0xff]  ;;  %p902_p11 = scmp.ne.s32.totalorder %s1228_s7, %s901_s9  ;;  %p1289_p0 = scmp.ne.s32.totalorder %s1284_s23, 0 }
  0x6e   : > { %v703_v21 = vpack.c.bf16 %v278_v17, %v277_v16  ;;  %v279_v22 = vld [vmem:[#allocation6 + $0x40] sm:$0xff]  ;;  %v280_v23 = vld [vmem:[#allocation6 + $0x48] sm:$0xff]  ;;  %v724_v24 = vpack.c.bf16 %v375_v20, %v374_v19  ;;  %v281_v26 = vld [vmem:[#allocation6 + $0x50] sm:$0xff]  ;;  %s981_s22 = smov [#allocation9]  }
  0x6f   : > { %719 = vmatpush3.bf16.msra.mxu1 %v718_v15  ;;  %v706_v25 = vpack.c.bf16 %v280_v23, %v279_v22  ;;  %v282_v27 = vld [vmem:[#allocation6 + $0x58] sm:$0xff]  ;;  %v283_v29 = vld [vmem:[#allocation6 + $0x60] sm:$0xff]  ;;  %v284_v30 = vld [vmem:[#allocation6 + $0x68] sm:$0xff]  ;;  %p903_p1 = pnand %p902_p11, %p1289_p0  ;;  %s905_s13 = sshll.u32 %s981_s22, 4  ;;  %s906_s13 = int_to_ptr.vmem [resolvable:$false] %s905_s13 }
  0x70   : > { %698 = vmatpush3.bf16.msra.mxu0 %v697_v7  ;;  %720 = vmatprep.subr.bf16.mxu1 %v978_v0  ;;  %v709_v28 = vpack.c.bf16 %v282_v27, %v281_v26  ;;  %v712_v31 = vpack.c.bf16 %v284_v30, %v283_v29  ;;  %v285_v32 = vld [vmem:[#allocation6 + $0x70] sm:$0xff]  ;;  %v286_v33 = vld [vmem:[#allocation6 + $0x78] sm:$0xff]  ;;  %v378_v39 = vld [vmem:[#allocation8 + $0x40] sm:$0xff]  ;;  %s907_s29 = scalar_lea.vmem %s906_s13, 256  ;;  %p908_p7 = scmp.lt.s32.totalorder %s1228_s7, %s906_s13 }
  0x71   : > { %699 = vmatprep.subr.bf16.mxu0 %v978_v0  ;;  %v715_v34 = vpack.c.bf16 %v286_v33, %v285_v32  ;;  %v270_v35 = vld [vmem:[%s1187_s17] sm:$0xff]  ;;  %v379_v40 = vld [vmem:[#allocation8 + $0x48] sm:$0xff]  ;;  %v382_v45 = vld [vmem:[#allocation8 + $0x60] sm:$0xff]  ;;  %p904_p3 = pneg %p903_p1  ;;  %p909_p9 = scmp.lt.s32.totalorder %s907_s29, %s901_s9 }
  0x72   : > { %v376_v36 = vld [vmem:[#allocation8 + $0x30] sm:$0xff]  ;;  %v377_v37 = vld [vmem:[#allocation8 + $0x38] sm:$0xff]  ;;  %v730_v41 = vpack.c.bf16 %v379_v40, %v378_v39  ;;  %v383_v46 = vld [vmem:[#allocation8 + $0x68] sm:$0xff] }
  0x73   : > { %722 = vmatpush3.bf16.msra.mxu1 %v721_v18  ;;  %v727_v38 = vpack.c.bf16 %v377_v37, %v376_v36  ;;  %v380_v42 = vld [vmem:[#allocation8 + $0x50] sm:$0xff]  ;;  %v381_v43 = vld [vmem:[#allocation8 + $0x58] sm:$0xff]  ;;  %v736_v47 = vpack.c.bf16 %v383_v46, %v382_v45  ;;  %p910_p12 = por %p909_p9, %p908_p7 }
  0x74   : > { %701 = vmatpush3.bf16.msra.mxu0 %v700_v14  ;;  %723 = vmatprep.subr.bf16.mxu1 %v978_v0  ;;  %v733_v44 = vpack.c.bf16 %v381_v43, %v380_v42  ;;  %v384_v48 = vld [vmem:[#allocation8 + $0x70] sm:$0xff]  ;;  %v385_v49 = vld [vmem:[#allocation8 + $0x78] sm:$0xff] }
  0x75   : > { %702 = vmatprep.subr.bf16.mxu0 %v978_v0  ;;  %v739_v50 = vpack.c.bf16 %v385_v49, %v384_v48  ;;  %v583_v51 = vld [vmem:[%s1272_s2] ss:$0 sm:$0xff]  ;;  %p911_p2 = pnand %p910_p12, %p904_p3 }
  0x76   : > { %v584_v60 = vld [vmem:[%s1274_s4] ss:$0 sm:$0xff] }
  0x77   : > { %725 = vmatpush3.bf16.msra.mxu1 %v724_v24 }
  0x78   : > { %704 = vmatpush3.bf16.msra.mxu0 %v703_v21  ;;  %726 = vmatprep.subr.bf16.mxu1 %v978_v0 }
  0x79   : > { %705 = vmatprep.subr.bf16.mxu0 %v978_v0 }
  0x7b   : > { %728 = vmatpush3.bf16.msra.mxu1 %v727_v38 }
  0x7c   : > { %707 = vmatpush3.bf16.msra.mxu0 %v706_v25  ;;  %729 = vmatprep.subr.bf16.mxu1 %v978_v0 }
  0x7d   : > { %708 = vmatprep.subr.bf16.mxu0 %v978_v0 }
  0x7f   : > { %731 = vmatpush3.bf16.msra.mxu1 %v730_v41 }
  0x80   : > { %710 = vmatpush3.bf16.msra.mxu0 %v709_v28  ;;  %732 = vmatprep.subr.bf16.mxu1 %v978_v0 }
  0x81   : > { %711 = vmatprep.subr.bf16.mxu0 %v978_v0 }
  0x83   : > { %734 = vmatpush3.bf16.msra.mxu1 %v733_v44 }
  0x84   : > { %713 = vmatpush3.bf16.msra.mxu0 %v712_v31  ;;  %735 = vmatprep.subr.bf16.mxu1 %v978_v0 }
  0x85   : > { %714 = vmatprep.subr.bf16.mxu0 %v978_v0 }
  0x87   : > { %737 = vmatpush3.bf16.msra.mxu1 %v736_v47 }
  0x88   : > { %716 = vmatpush3.bf16.msra.mxu0 %v715_v34  ;;  %738 = vmatprep.subr.bf16.mxu1 %v978_v0 }
  0x8b   : > { %656 = vmatmul.mubr.f32.vlgmr.msra.gmra.mrb[0].mxu0 %v270_v35  ;;  %740 = vmatpush3.bf16.msra.mxu1 %v739_v50 }
 0x15e   : > { %v360_v52 = vpop.f32.mrb[0].mxu0 }
 0x15f   : > { %v361_v53 = vadd.f32 %v583_v51, %v360_v52  ;;  %v657_v54 = vpop.f32.mrb[1].mxu0 }
 0x161   : > { %v365_v55 = vmul.f32 0.70710677, %v361_v53  ;;  %v364_v57 = vmul.f32 0.5, %v361_v53 }
 0x163   : > { %813 = verf.f32 %v365_v55 }
 0x16d   : > { %v814_v56 = vpop.eup %813 }
 0x16e   : > { %v367_v58 = vadd.f32 1.0, %v814_v56 }
 0x170   : > { %v368_v59 = vmul.f32 %v367_v58, %v364_v57 }
 0x172   : > { %691 = vmatmul.mubr.f32.vlgmr.msra.gmra.mrb[0].mxu1 %v368_v59 }
 0x245   : > { %v452_v61 = vpop.f32.mrb[0].mxu1 }
 0x246   : > { %v466_v62 = vadd.f32 %v584_v60, %v452_v61  ;;  %v692_v63 = vpop.f32.mrb[1].mxu1 }
 0x248   : > { %467 = vst [vmem:[%s268_s28] sm:$0xff] %v466_v62 }
 0x249   : > { %914 = shalt.err (!%p911_p2)
}
 0x24a   : > { %s915_s12 = scalar_lea.hbm %s1226_s15, 128  ;;  %s919_s26 = scalar_lea.hbm %s1275_s5, 256 }
 0x24b   : > { %p916_p13 = scmp.ne.s32.totalorder %s1226_s15, %s915_s12  ;;  %p920_p4 = scmp.lt.u32.totalorder %s1226_s15, %s1275_s5 }
 0x24c   : > { %p921_p5 = scmp.lt.u32.totalorder %s919_s26, %s915_s12  ;;  %p923_p11 = scmp.lt.u32.totalorder %s915_s12, %s1226_s15 }
 0x24d   : > { %p917_p6 = pnand %p916_p13, %p1289_p0 }
 0x24e   : > { %p922_p8 = por %p921_p5, %p920_p4 }
 0x24f   : > { %p918_p10 = pneg %p917_p6 }
 0x250   : > { %p924_p1 = por %p923_p11, %p922_p8 }
 0x252   : > { %p925_p3 = pnand %p924_p1, %p918_p10 }
 0x254   : > { %928 = shalt.err (!%p925_p3)
}
 0x255   : > { %751 = dma.vmem_to_hbm [thread:$0]  (%p1289_p0), %s1228_s7, 128, %s1226_s15, %s469_s16  }
 0x256 PF: > { %s494_s11 = sand.u32 1, %s959_s18   ;;  %p1290_p7 = scmp.ne.s32.totalorder %s1280_s25, 0 }
 0x257   : > { %p1291_p9 = scmp.ge.s32.totalorder %s971_s21, 2  ;;  %s495_s28 = scalar_lea.sflag [#allocation5], %s494_s11 }
 0x259   : > { %p765_p12 = pnand %p1291_p9, %p1290_p7 }
 0x25b   : > { %954 = dma.done.wait (!%p765_p12), %s495_s28, 128  }
 0x25c   : > { %956 = vsyncadd (!%p765_p12), %s495_s28, 4294967168  ;;  %p19_p2 = scmp.ge.s32.totalorder %s1122_s14, 4   ;;  %s1292_s18 = smov %s963_s19 }
 0x25d   : > { %s1293_s19 = smov %s967_s20  ;;  %s1294_s20 = smov %s1138_s27 }
 0x25e   : > { %s1295_s21 = smov %s1122_s14  ;;  %21 = sbr.rel (!%p19_p2) target bundleno = 6 (0x6), region = 93 }
 0x265   :  { %500 = vsyncpa [#allocation4], 1 }
 0x266   :  { %502 = vsyncpa [#allocation4 + $0x1], 1 }
 0x267   :  { %503 = vsyncpa [#allocation7], 1 }
 0x268   :  { %504 = vsyncpa [#allocation5], 1 }
 0x269   :  { %506 = vsyncpa [#allocation5 + $0x1], 1 }

</bundles_post_ra>
